<compile_context>
chip_gen: v7x
topology: tpu7x:2x2x1
jax: 0.10.0
libtpu: 0.0.40
codegen_flags: <defaults>
</compile_context>

<pallas_src>
import functools
import math

import jax
import jax.numpy as jnp
from jax import lax
from jax.experimental import pallas as pl
from jax.experimental.pallas import tpu as pltpu


def _round_up(x, m):
    return ((x + m - 1) // m) * m


def _cdiv(a, b):
    return -(-a // b)


def _linear_kernel_resident(x_ref, w_ref, b_ref, o_ref, *, tn):
    # x_ref: (tm, H)      activation tile
    # w_ref: (O_pad, H)   whole weight, VMEM-resident (constant block index)
    # b_ref: (1, tn)      bias tile for this output column block
    # o_ref: (tm, tn)
    j = pl.program_id(1)
    off = pl.multiple_of(j * tn, 128)
    w = w_ref[pl.ds(off, tn), :]                      # (tn, H) strip
    acc = lax.dot_general(
        x_ref[...], w,
        dimension_numbers=(((1,), (1,)), ((), ())),   # x @ W.T on the MXU
        preferred_element_type=jnp.float32,
    )
    o_ref[...] = (acc + b_ref[...]).astype(o_ref.dtype)


def _linear_kernel_streamed(x_ref, w_ref, b_ref, o_ref):
    # x_ref: (tm, H); w_ref: (tn, H); b_ref: (1, tn); o_ref: (tm, tn)
    acc = lax.dot_general(
        x_ref[...], w_ref[...],
        dimension_numbers=(((1,), (1,)), ((), ())),
        preferred_element_type=jnp.float32,
    )
    o_ref[...] = (acc + b_ref[...]).astype(o_ref.dtype)


def dec_ast2vector_forward(
    dh, W, b, *,
    tm_max=512, tn_max=256,
    vmem_budget_bytes=40 * 1024 * 1024,        # conservative: v7x has 64 MiB/TC
    weight_resident_max_bytes=8 * 1024 * 1024,  # single-copy W budget
):
    """dh: (B, S, H); W: (O, H) PyTorch layout; b: (O,). Returns (B, S, O)."""
    B, S, H = dh.shape
    O = W.shape[0]
    M = B * S
    x = dh.reshape(M, H)

    xb = jnp.dtype(dh.dtype).itemsize
    wb = jnp.dtype(W.dtype).itemsize
    ob = xb
    # Sublane packing of the activation dtype (8 rows for 32-bit, 16 for bf16).
    sub = {4: 8, 2: 16, 1: 32}.get(xb, 8)

    # ---- tile sizes -------------------------------------------------------
    # Output columns: lane-dense (>=128, multiple of 128) to avoid vst.msk.
    tn = max(128, min(_round_up(tn_max, 128), _round_up(O, 128)))
    # Rows: never exceed M (so block dims stay <= array dims); round to sublane.
    if M >= sub:
        tm = min(_round_up(tm_max, sub), (M // sub) * sub)
    else:
        tm = sub
        x = jnp.pad(x, ((0, sub - M), (0, 0)))        # tiny pad, < one sublane

    def _streamed_need(tm_, tn_):
        # double-buffered x, W, bias and output blocks
        return 2 * (tm_ * H * xb + tn_ * H * wb + tn_ * wb + tm_ * tn_ * ob)

    # Shrink tiles until the double-buffered window fits the VMEM budget.
    while _streamed_need(tm, tn) > vmem_budget_bytes and (tm > sub or tn > 128):
        if tm >= tn and tm > sub:
            tm = max(sub, ((tm // 2) // sub) * sub)
        elif tn > 128:
            tn = max(128, ((tn // 2) // 128) * 128)
        else:
            break

    O_pad = _round_up(O, tn)
    n_i = _cdiv(M, tm)
    n_j = O_pad // tn
    M_alloc = n_i * tm

    # Zero-pad weight rows / bias (cheap: O(O*H), reused columns sliced off).
    Wp = W if O_pad == O else jnp.pad(W, ((0, O_pad - O), (0, 0)))
    bp = b if O_pad == O else jnp.pad(b, (0, O_pad - O))
    bias = bp.reshape(1, O_pad)

    # ---- choose weight-resident vs streamed path --------------------------
    w_bytes = O_pad * H * wb
    resident_need = (2 * w_bytes                      # (double-buffered by Pallas)
                     + 2 * (tm * H * xb + tn * wb + tm * tn * ob))
    use_resident = (w_bytes <= weight_resident_max_bytes
                    and resident_need <= vmem_budget_bytes)

    if use_resident:
        kernel = functools.partial(_linear_kernel_resident, tn=tn)
        grid = (n_i, n_j)                              # j innermost
        in_specs = [
            pl.BlockSpec((tm, H), lambda i, j: (i, 0)),      # x tile
            pl.BlockSpec((O_pad, H), lambda i, j: (0, 0)),   # resident W
            pl.BlockSpec((1, tn), lambda i, j: (0, j)),      # bias strip
        ]
        out_specs = pl.BlockSpec((tm, tn), lambda i, j: (i, j))
        vmem_need = resident_need
    else:
        kernel = _linear_kernel_streamed
        # Pick grid order minimizing total re-streamed HBM bytes.
        bytes_a = (M_alloc + n_i * O_pad) * H          # i outer, j inner
        bytes_b = (O_pad + n_j * M_alloc) * H          # j outer, i inner
        if bytes_a <= bytes_b:
            grid = (n_i, n_j)
            in_specs = [
                pl.BlockSpec((tm, H), lambda i, j: (i, 0)),
                pl.BlockSpec((tn, H), lambda i, j: (j, 0)),
                pl.BlockSpec((1, tn), lambda i, j: (0, j)),
            ]
            out_specs = pl.BlockSpec((tm, tn), lambda i, j: (i, j))
        else:
            grid = (n_j, n_i)
            in_specs = [
                pl.BlockSpec((tm, H), lambda j, i: (i, 0)),
                pl.BlockSpec((tn, H), lambda j, i: (j, 0)),
                pl.BlockSpec((1, tn), lambda j, i: (0, j)),
            ]
            out_specs = pl.BlockSpec((tm, tn), lambda j, i: (i, j))
        vmem_need = _streamed_need(tm, tn)

    vmem_limit = int(min(max(vmem_need + (8 << 20), 24 << 20), 56 << 20))

    cost = pl.CostEstimate(
        flops=int(2 * M_alloc * O_pad * H),
        transcendentals=0,
        bytes_accessed=int(M * H * xb + O_pad * H * wb + M_alloc * O_pad * ob),
    )

    out = pl.pallas_call(
        kernel,
        out_shape=jax.ShapeDtypeStruct((M_alloc, O_pad), dh.dtype),
        grid_spec=pl.GridSpec(grid=grid, in_specs=in_specs, out_specs=out_specs),
        compiler_params=pltpu.CompilerParams(
            dimension_semantics=("parallel", "parallel"),
            vmem_limit_bytes=vmem_limit,
        ),
        cost_estimate=cost,
    )(x, Wp, bias)

    if M_alloc != M or O_pad != O:
        out = out[:M, :O]
    return out.reshape(B, S, O)


def xavier_uniform(key, shape, gain):
    # matches torch.nn.init.xavier_uniform_ for a 2-D (fan_out, fan_in) weight
    fan_out, fan_in = shape
    bound = gain * math.sqrt(6.0 / (fan_in + fan_out))
    return jax.random.uniform(key, shape, jnp.float32, -bound, bound)


def _make_params(key, hidden_dim, output_dim):
    k_w, k_b = jax.random.split(key)
    W = xavier_uniform(k_w, (output_dim, hidden_dim), gain=1.414)
    b_bound = 1.0 / math.sqrt(hidden_dim)
    b = jax.random.uniform(k_b, (output_dim,), jnp.float32, -b_bound, b_bound)
    return W, b


def _check(dh, W, b, **kw):
    out = dec_ast2vector_forward(dh, W, b, **kw)
    jax.block_until_ready(out)
    ref = jnp.einsum("bsh,oh->bso", dh, W) + b
    assert out.shape == ref.shape
    assert jnp.allclose(out, ref, atol=1e-5, rtol=1e-5)
    return out


if __name__ == "__main__":
    key = jax.random.PRNGKey(0)
    k0, k1, k2, k3 = jax.random.split(key, 4)

    # 1) Module-consistent small shapes (batch of 2 trees, 8 nodes, H=O=32).
    #    Exercises the weight-resident path (W fits easily in VMEM).
    B, S, Hd, Od = 2, 8, 32, 32
    W, b = _make_params(k0, Hd, Od)
    dh = jax.random.normal(k0, (B, S, Hd), jnp.float32)
    Wh = _check(dh, W, b)
    assert Wh.shape == (B, S, Od)

    # 2) Resident path with multiple output-column blocks and a clamped
    #    (non-divisible) M block: exercises the in-kernel pl.ds weight slice.
    W2, b2 = _make_params(k1, 48, 192)
    dh2 = jax.random.normal(k1, (2, 50, 48), jnp.float32)
    _check(dh2, W2, b2, tn_max=128)

    # 3) Streamed fallback (residency disabled), M-innermost grid order.
    _check(dh2, W2, b2, tn_max=128, weight_resident_max_bytes=0)

    # 4) Streamed fallback, O-innermost grid order (small M, larger O).
    W4, b4 = _make_params(k2, 32, 512)
    dh4 = jax.random.normal(k3, (2, 8, 32), jnp.float32)
    _check(dh4, W4, b4, tn_max=128, weight_resident_max_bytes=0)

    print("KERNEL_OK")
</pallas_src>

<mosaic_0001>
module attributes {stable_mosaic.version = 11 : i64} {
  func.func @_linear_kernel_resident(%arg0: i32, %arg1: i32, %arg2: memref<16x32xf32, #tpu.memory_space<vmem>>, %arg3: memref<128x32xf32, #tpu.memory_space<vmem>>, %arg4: memref<1x128xf32, #tpu.memory_space<vmem>>, %arg5: memref<16x128xf32, #tpu.memory_space<vmem>>) attributes {dimension_semantics = [#tpu.dimension_semantics<parallel>, #tpu.dimension_semantics<parallel>], iteration_bounds = array<i64: 1, 1>, scalar_prefetch = 0 : i64, scratch_operands = 0 : i64, tpu.core_type = #tpu.core_type<tc>, window_params = [{transform_indices = @transform_0, window_bounds = array<i64: 16, 32>}, {pipeline_mode = #tpu.pipeline_mode<synchronous>, transform_indices = @transform_1, window_bounds = array<i64: 128, 32>}, {transform_indices = @transform_2, window_bounds = array<i64: 1, 128>}, {transform_indices = @transform_3, window_bounds = array<i64: 16, 128>}]} {
    %c128_i32 = arith.constant 128 : i32
    %0 = arith.muli %arg1, %c128_i32 : i32
    %1 = tpu.assume_multiple %0, 128 : i32
    %2 = arith.index_cast %1 : i32 to index
    %c0 = arith.constant 0 : index
    %3 = vector.load %arg3[%2, %c0] : memref<128x32xf32, #tpu.memory_space<vmem>>, vector<128x32xf32>
    %c0_0 = arith.constant 0 : index
    %c0_1 = arith.constant 0 : index
    %4 = vector.load %arg2[%c0_0, %c0_1] : memref<16x32xf32, #tpu.memory_space<vmem>>, vector<16x32xf32>
    %cst = arith.constant dense<0.000000e+00> : vector<16x128xf32>
    %5 = tpu.matmul %4, %3, %cst {dimension_numbers = #tpu.dot_dimension_numbers<[1], [1], [0], [0], [0, 0, 1, 0], [], []>} : vector<16x32xf32>, vector<128x32xf32>, vector<16x128xf32> -> vector<16x128xf32>
    %c0_2 = arith.constant 0 : index
    %c0_3 = arith.constant 0 : index
    %6 = vector.load %arg4[%c0_2, %c0_3] : memref<1x128xf32, #tpu.memory_space<vmem>>, vector<1x128xf32>
    %7 = vector.broadcast %6 : vector<1x128xf32> to vector<16x128xf32>
    %8 = arith.addf %5, %7 : vector<16x128xf32>
    %c0_4 = arith.constant 0 : index
    %c0_5 = arith.constant 0 : index
    %9 = vector.load %arg5[%c0_4, %c0_5] : memref<16x128xf32, #tpu.memory_space<vmem>>, vector<16x128xf32>
    tpu.vector_store %arg5[%c0_4, %c0_5], %8 {strides = array<i32>} : memref<16x128xf32, #tpu.memory_space<vmem>>, vector<16x128xf32>,
    return
  }
  func.func @transform_0(%arg0: i32, %arg1: i32) -> (i32, i32) {
    %c0_i32 = arith.constant 0 : i32
    %c0_i32_0 = arith.constant 0 : i32
    return %arg0, %c0_i32 : i32, i32
  }
  func.func @transform_1(%arg0: i32, %arg1: i32) -> (i32, i32) {
    %c0_i32 = arith.constant 0 : i32
    %c0_i32_0 = arith.constant 0 : i32
    %c0_i32_1 = arith.constant 0 : i32
    return %c0_i32, %c0_i32_0 : i32, i32
  }
  func.func @transform_2(%arg0: i32, %arg1: i32) -> (i32, i32) {
    %c0_i32 = arith.constant 0 : i32
    %c0_i32_0 = arith.constant 0 : i32
    return %c0_i32, %arg1 : i32, i32
  }
  func.func @transform_3(%arg0: i32, %arg1: i32) -> (i32, i32) {
    %c0_i32 = arith.constant 0 : i32
    return %arg0, %arg1 : i32, i32
  }
}

</mosaic_0001>

<bundles_post_ra>
// kernel: tpu_custom_call.1
= control target key start
LH: loop header
LB: loop body
LE: loop exit
PB: predicated region body
PF: predicated region fallthrough
CT: control target
= control target key end

     0   :  { %vm42_vm0 = vcmask 261120   ;;  %s469_s0 = inlined_call_operand.vmem [shape: f32[16,32], index: 0, kind: input, shape index: {}]   ;;  %s470_s1 = inlined_call_operand.vmem [shape: f32[128,32], index: 1, kind: input, shape index: {}]   ;;  %s471_s2 = inlined_call_operand.vmem [shape: f32[1,128], index: 2, kind: input, shape index: {}]   ;;  %s472_s3 = inlined_call_operand.hbm [shape: f32[16,128], index: 3, kind: output, shape index: {}]  }
   0x1   :  { %v17_v0 = vld [vmem:[%s470_s1] sm:$0xff]  ;;  %v18_v1 = vld [vmem:[%s470_s1 + $0x8] sm:$0xff]  ;;  %v19_v2 = vld [vmem:[%s470_s1 + $0x10] sm:$0xff] }
   0x2   :  { %v262_v3 = vpack.c.bf16 %v18_v1, %v17_v0  ;;  %vm371_vm1 = vmpackc.low %vm42_vm0, %vm42_vm0  ;;  %v20_v5 = vld [vmem:[%s470_s1 + $0x18] sm:$0xff]  ;;  %v33_v7 = vld [vmem:[%s469_s0] sm:$0xff] }
   0x3   :  { %v268_v6 = vpack.c.bf16 %v20_v5, %v19_v2  ;;  %v21_v8 = vld [vmem:[%s470_s1 + $0x20] sm:$0xff]  ;;  %v22_v9 = vld [vmem:[%s470_s1 + $0x28] sm:$0xff]  ;;  %259 = vmatprep.mubr.msk.f32.mxu0 %vm42_vm0, %v33_v7 }
   0x4   :  { %264 = vmatprep.subr.msk.bf16.mxu0 %vm371_vm1, %v262_v3 }
   0x5   :  { %267 = vmatpush3.bf16.xpose.msk.msra.mxu0 %vm371_vm1, %v262_v3 }
   0x6   :  { %270 = vmatprep.subr.msk.bf16.mxu0 %vm371_vm1, %v268_v6 }
   0x7   :  { %8 = vsyncpa [#allocation3], 0  ;;  %v274_v10 = vpack.c.bf16 %v22_v9, %v21_v8  ;;  %v23_v11 = vld [vmem:[%s470_s1 + $0x30] sm:$0xff]  ;;  %v24_v12 = vld [vmem:[%s470_s1 + $0x38] sm:$0xff] }
   0x8   :  { %v280_v13 = vpack.c.bf16 %v24_v12, %v23_v11  ;;  %v25_v14 = vld [vmem:[%s470_s1 + $0x40] sm:$0xff]  ;;  %v26_v15 = vld [vmem:[%s470_s1 + $0x48] sm:$0xff]  ;;  %v27_v17 = vld [vmem:[%s470_s1 + $0x50] sm:$0xff] }
   0x9   :  { %v286_v16 = vpack.c.bf16 %v26_v15, %v25_v14  ;;  %v28_v18 = vld [vmem:[%s470_s1 + $0x58] sm:$0xff]  ;;  %v29_v20 = vld [vmem:[%s470_s1 + $0x60] sm:$0xff]  ;;  %v30_v21 = vld [vmem:[%s470_s1 + $0x68] sm:$0xff] }
   0xa   :  { %v292_v19 = vpack.c.bf16 %v28_v18, %v27_v17  ;;  %v298_v22 = vpack.c.bf16 %v30_v21, %v29_v20  ;;  %v31_v23 = vld [vmem:[%s470_s1 + $0x70] sm:$0xff]  ;;  %v32_v24 = vld [vmem:[%s470_s1 + $0x78] sm:$0xff]  ;;  %v34_v26 = vld [vmem:[%s469_s0 + $0x8] sm:$0xff]  ;;  %s337_s1 = smov [#allocation2]  }
   0xb   :  { %v304_v25 = vpack.c.bf16 %v32_v24, %v31_v23  ;;  %v190_v27 = vld [vmem:[%s471_s2] ss:$0 sm:$0xff]  ;;  %s179_s23 = sshll.u32 %s337_s1, 4  ;;  %s180_s23 = int_to_ptr.vmem [resolvable:$true] %s179_s23 }
   0xc   :  { %s313_s24 = scalar_lea.vmem %s180_s23, 256  ;;  %p318_p1 = scmp.lt.s32.totalorder %s180_s23, %s180_s23 }
   0xd   :  { %273 = vmatpush3.bf16.xpose.msk.msra.mxu0 %vm371_vm1, %v268_v6  ;;  %p314_p0 = scmp.ne.s32.totalorder %s180_s23, %s313_s24  ;;  %p319_p2 = scmp.lt.s32.totalorder %s313_s24, %s313_s24 }
   0xe   :  { %276 = vmatprep.subr.msk.bf16.mxu0 %vm371_vm1, %v274_v10 }
   0xf   :  { %p320_p3 = por %p319_p2, %p318_p1 }
  0x11   :  { %p321_p4 = pnand %p320_p3, %p314_p0 }
  0x15   :  { %279 = vmatpush3.bf16.xpose.msk.msra.mxu0 %vm371_vm1, %v274_v10 }
  0x16   :  { %282 = vmatprep.subr.msk.bf16.mxu0 %vm371_vm1, %v280_v13 }
  0x1d   :  { %285 = vmatpush3.bf16.xpose.msk.msra.mxu0 %vm371_vm1, %v280_v13 }
  0x1e   :  { %288 = vmatprep.subr.msk.bf16.mxu0 %vm371_vm1, %v286_v16 }
  0x25   :  { %291 = vmatpush3.bf16.xpose.msk.msra.mxu0 %vm371_vm1, %v286_v16 }
  0x26   :  { %294 = vmatprep.subr.msk.bf16.mxu0 %vm371_vm1, %v292_v19 }
  0x2d   :  { %297 = vmatpush3.bf16.xpose.msk.msra.mxu0 %vm371_vm1, %v292_v19 }
  0x2e   :  { %300 = vmatprep.subr.msk.bf16.mxu0 %vm371_vm1, %v298_v22 }
  0x35   :  { %303 = vmatpush3.bf16.xpose.msk.msra.mxu0 %vm371_vm1, %v298_v22 }
  0x36   :  { %306 = vmatprep.subr.msk.bf16.mxu0 %vm371_vm1, %v304_v25 }
  0x3d   :  { %309 = vmatpush3.bf16.xpose.msk.msra.mxu0 %vm371_vm1, %v304_v25 }
  0x44   :  { %260 = vmatmul.mubr.msk.f32.vlgmr.msra.gmra.mrb[0].mxu0 %vm42_vm0, %v34_v26 }
 0x117   :  { %v261_v28 = vpop.f32.mrb[0].mxu0 }
 0x118   :  { %v169_v29 = vadd.f32 %v261_v28, %v190_v27  ;;  %v163_v30 = vpop.f32.mrb[1].mxu0 }
 0x119   :  { %v164_v31 = vadd.f32 %v190_v27, %v163_v30 }
 0x11a   :  { %173 = vst [vmem:[#allocation2 + $0x8] sm:$0xff] %v169_v29 }
 0x11b   :  { %172 = vst [vmem:[#allocation2] sm:$0xff] %v164_v31 }
 0x11c   :  { %324 = shalt.err (!%p321_p4)
}
 0x11d   :  { %s325_s2 = scalar_lea.hbm %s472_s3, 256 }
 0x11e   :  { %p326_p5 = scmp.ne.s32.totalorder %s472_s3, %s325_s2  ;;  %p329_p6 = scmp.lt.u32.totalorder %s325_s2, %s472_s3 }
 0x120   :  { %p331_p7 = pnand %p329_p6, %p326_p5 }
 0x122   :  { %334 = shalt.err (!%p331_p7)
}
 0x123   :  { %s338_s30 = smov 128   ;;  %s339_s4 = smov 8  }
 0x124   :  { %185 = dma.vmem_to_hbm [thread:$0]  %s180_s23, 256, %s472_s3, [#allocation3], %s338_s30, %s338_s30, %s339_s4  }
 0x125   :  { %335 = dma.done.wait [#allocation3], 256  }
 0x126   :  { %336 = vsyncadd [#allocation3], 4294967040 }
 0x127   :  { %189 = vsyncpa [#allocation3], 1 }

</bundles_post_ra>
